<compile_context>
chip_gen: v7x
topology: tpu7x:2x2x1
jax: 0.10.0
libtpu: 0.0.40
codegen_flags: <defaults>
</compile_context>

<pallas_src>
import functools
import math

import jax
import jax.numpy as jnp
from jax import lax
from jax.experimental import pallas as pl
from jax.experimental.pallas import tpu as pltpu


def _round_up(v, m):
    return -(-v // m) * m


def _layer_norm_kernel(x_ref, a_ref, b_ref, o_ref, *, eps):
    """Generic path: one (rt, F) lane-major block per step."""
    x = x_ref[...].astype(jnp.float32)            # (rt, F)
    a = a_ref[...].astype(jnp.float32)            # (1, F)
    b = b_ref[...].astype(jnp.float32)            # (1, F)

    f = x.shape[-1]
    mean = jnp.sum(x, axis=-1, keepdims=True) * (1.0 / f)
    xc = x - mean
    # torch.Tensor.std -> unbiased estimator (divide by N-1).
    var = jnp.sum(xc * xc, axis=-1, keepdims=True) * (1.0 / (f - 1))
    inv = 1.0 / (jnp.sqrt(var) + eps)             # eps added to std, as in module
    o_ref[...] = (a * (xc * inv) + b).astype(o_ref.dtype)


def _layer_norm_packed_kernel(x_ref, a_ref, b_ref, m_ref, o_ref, *, eps, feat):
    """Packed path (F < 128): g = 128 // F rows share one 128-lane row.

    Segment sums are computed with a 0/1 indicator matmul on the MXU (idle in
    this memory-bound kernel); HIGHEST precision keeps full f32 accuracy.
    """
    x = x_ref[...].astype(jnp.float32)            # (rt, 128)
    a = a_ref[...].astype(jnp.float32)            # (1, 128)  a_2 tiled g times
    b = b_ref[...].astype(jnp.float32)            # (1, 128)
    m = m_ref[...]                                # (128, 128) 1.0 iff same segment

    dot = functools.partial(jnp.dot, preferred_element_type=jnp.float32,
                            precision=lax.Precision.HIGHEST)
    mean = dot(x, m) * (1.0 / feat)               # per-segment mean, per-lane bcast
    xc = x - mean
    var = dot(xc * xc, m) * (1.0 / (feat - 1))    # unbiased
    inv = 1.0 / (jnp.sqrt(var) + eps)
    o_ref[...] = (a * (xc * inv) + b).astype(o_ref.dtype)


def _choose_block_rows(n_rows, width, itemsize):
    """Pick rows-per-block by bytes (VMEM-capped); return (rt, vmem_limit_bytes)."""
    target_block_bytes = 2 << 20       # ~2 MiB input blocks: near-roofline streaming
    vmem_footprint_budget = 24 << 20   # comfortably inside v7x's 64 MiB VMEM / core

    row_in_bytes = width * itemsize
    row_out_bytes = width * itemsize
    row_tmp_bytes = width * 4 * 4      # ~4 f32 temporaries (x, xc, xc^2, result)
    # Pallas double-buffers the pipelined input and output blocks.
    row_footprint = 2 * row_in_bytes + 2 * row_out_bytes + row_tmp_bytes

    rt = max(8, (target_block_bytes // max(row_in_bytes, 1)) // 8 * 8)
    rt = min(rt, max(8, (vmem_footprint_budget // row_footprint) // 8 * 8))
    rt = min(rt, _round_up(n_rows, 8))             # no bigger than the array
    if n_rows > 8:
        # Prefer >= ~8 grid steps (feeds both v7x TCs and the DMA pipeline),
        # but never shrink below 8 rows per block.
        rt_for_steps = _round_up(-(-n_rows // 8), 8)
        rt = max(8, min(rt, rt_for_steps))
    rt = max(8, rt)

    footprint = rt * row_footprint
    vmem_limit = int(min(64 << 20, max(32 << 20, footprint + (8 << 20))))
    return rt, vmem_limit


def layer_norm(x, a_2, b_2, *, eps=1e-6):
    """Pallas LayerNorm over the last axis of x. a_2 / b_2 have shape (F,)."""
    orig_shape = x.shape
    f = orig_shape[-1]
    if f < 2:
        raise ValueError("LayerNorm needs features >= 2 (unbiased std divides by F-1).")
    r = math.prod(orig_shape[:-1])
    itemsize = jnp.dtype(x.dtype).itemsize

    # Lane-dense repacking for small feature sizes (F < 128, 128 % F == 0).
    use_packed = (f < 128) and (128 % f == 0) and (r % (128 // f) == 0)
    if use_packed:
        g = 128 // f
        w = 128
        rows = r // g
        x2 = x.reshape(rows, w)                   # free row-major view
        a2 = jnp.tile(a_2.reshape(-1), (g,)).reshape(1, w)
        b2 = jnp.tile(b_2.reshape(-1), (g,)).reshape(1, w)
        seg = jnp.arange(w, dtype=jnp.int32) // f
        seg_mat = (seg[:, None] == seg[None, :]).astype(jnp.float32)
        kernel = functools.partial(_layer_norm_packed_kernel, eps=eps, feat=f)
    else:
        w = f
        rows = r
        x2 = x.reshape(rows, w)
        a2 = a_2.reshape(1, w)
        b2 = b_2.reshape(1, w)
        seg_mat = None
        kernel = functools.partial(_layer_norm_kernel, eps=eps)

    rt, vmem_limit = _choose_block_rows(rows, w, itemsize)
    grid = (pl.cdiv(rows, rt),)                   # ragged tail masked by Pallas

    in_specs = [pl.BlockSpec((rt, w), lambda i: (i, 0)),
                pl.BlockSpec((1, w), lambda i: (0, 0)),
                pl.BlockSpec((1, w), lambda i: (0, 0))]
    args = [x2, a2, b2]
    if use_packed:
        in_specs.append(pl.BlockSpec((w, w), lambda i: (0, 0)))
        args.append(seg_mat)

    cost = pl.CostEstimate(
        flops=int(10 * rows * w),
        transcendentals=int(rows),
        bytes_accessed=int(2 * rows * w * itemsize + 2 * w * itemsize),
    )

    out = pl.pallas_call(
        kernel,
        out_shape=jax.ShapeDtypeStruct((rows, w), x.dtype),
        grid_spec=pltpu.PrefetchScalarGridSpec(
            num_scalar_prefetch=0,
            grid=grid,
            in_specs=in_specs,
            out_specs=pl.BlockSpec((rt, w), lambda i: (i, 0))),
        compiler_params=pltpu.CompilerParams(
            dimension_semantics=("parallel",),
            vmem_limit_bytes=vmem_limit),
        cost_estimate=cost,
    )(*args)

    return out.reshape(orig_shape)


def _reference_forward(x, a_2, b_2, eps):
    """Pure-JAX mirror of the PyTorch LayerNorm forward (unbiased std)."""
    mean = jnp.mean(x, axis=-1, keepdims=True)
    var = jnp.sum((x - mean) ** 2, axis=-1, keepdims=True) / (x.shape[-1] - 1)
    std = jnp.sqrt(var)
    return a_2 * (x - mean) / (std + eps) + b_2


if __name__ == "__main__":
    key = jax.random.PRNGKey(0)

    # 1) Module-typical small shape (F=32 -> exercises the lane-dense packed path).
    B, S, H = 2, 8, 32
    kx, ka, kb, kx2, ka2, kb2 = jax.random.split(key, 6)
    x = jax.random.normal(kx, (B, S, H), dtype=jnp.float32)
    a_2 = 1.0 + 0.1 * jax.random.normal(ka, (H,), dtype=jnp.float32)
    b_2 = 0.1 * jax.random.normal(kb, (H,), dtype=jnp.float32)

    y = jax.jit(layer_norm)(x, a_2, b_2)
    y = jax.block_until_ready(y)
    y_ref = _reference_forward(x, a_2, b_2, 1e-6)
    assert y.shape == x.shape
    assert jnp.allclose(y, y_ref, atol=1e-5, rtol=1e-5)

    # 2) Generic path with F % 128 == 0 and a ragged row count (partial block).
    B2, S2, H2 = 3, 5, 256
    xg = jax.random.normal(kx2, (B2, S2, H2), dtype=jnp.float32)
    ag = 1.0 + 0.1 * jax.random.normal(ka2, (H2,), dtype=jnp.float32)
    bg = 0.1 * jax.random.normal(kb2, (H2,), dtype=jnp.float32)

    yg = jax.jit(layer_norm)(xg, ag, bg)
    yg = jax.block_until_ready(yg)
    yg_ref = _reference_forward(xg, ag, bg, 1e-6)
    assert yg.shape == xg.shape
    assert jnp.allclose(yg, yg_ref, atol=1e-5, rtol=1e-5)

    print("KERNEL_OK")
</pallas_src>

<mosaic_0001>
module attributes {stable_mosaic.version = 11 : i64} {
  func.func @_layer_norm_packed_kernel(%arg0: i32, %arg1: memref<8x128xf32, #tpu.memory_space<vmem>>, %arg2: memref<1x128xf32, #tpu.memory_space<vmem>>, %arg3: memref<1x128xf32, #tpu.memory_space<vmem>>, %arg4: memref<128x128xf32, #tpu.memory_space<vmem>>, %arg5: memref<8x128xf32, #tpu.memory_space<vmem>>) attributes {dimension_semantics = [#tpu.dimension_semantics<parallel>], iteration_bounds = array<i64: 1>, scalar_prefetch = 0 : i64, scratch_operands = 0 : i64, tpu.core_type = #tpu.core_type<tc>, window_params = [{transform_indices = @transform_0, window_bounds = array<i64: 8, 128>}, {pipeline_mode = #tpu.pipeline_mode<synchronous>, transform_indices = @transform_1, window_bounds = array<i64: 1, 128>}, {pipeline_mode = #tpu.pipeline_mode<synchronous>, transform_indices = @transform_2, window_bounds = array<i64: 1, 128>}, {pipeline_mode = #tpu.pipeline_mode<synchronous>, transform_indices = @transform_3, window_bounds = array<i64: 128, 128>}, {transform_indices = @transform_4, window_bounds = array<i64: 8, 128>}]} {
    %c0 = arith.constant 0 : index
    %c0_0 = arith.constant 0 : index
    %0 = vector.load %arg1[%c0, %c0_0] : memref<8x128xf32, #tpu.memory_space<vmem>>, vector<8x128xf32>
    %c0_1 = arith.constant 0 : index
    %c0_2 = arith.constant 0 : index
    %1 = vector.load %arg2[%c0_1, %c0_2] : memref<1x128xf32, #tpu.memory_space<vmem>>, vector<1x128xf32>
    %c0_3 = arith.constant 0 : index
    %c0_4 = arith.constant 0 : index
    %2 = vector.load %arg3[%c0_3, %c0_4] : memref<1x128xf32, #tpu.memory_space<vmem>>, vector<1x128xf32>
    %c0_5 = arith.constant 0 : index
    %c0_6 = arith.constant 0 : index
    %3 = vector.load %arg4[%c0_5, %c0_6] : memref<128x128xf32, #tpu.memory_space<vmem>>, vector<128x128xf32>
    %cst = arith.constant dense<0.000000e+00> : vector<8x128xf32>
    %4 = tpu.matmul %0, %3, %cst {dimension_numbers = #tpu.dot_dimension_numbers<[1], [0], [0], [1], [0, 0, 1, 1], [], []>, precision = #tpu.contract_precision<fp32>} : vector<8x128xf32>, vector<128x128xf32>, vector<8x128xf32> -> vector<8x128xf32>
    %cst_7 = arith.constant 3.125000e-02 : f32
    %5 = vector.broadcast %cst_7 : f32 to vector<8x128xf32>
    %6 = arith.mulf %4, %5 : vector<8x128xf32>
    %7 = arith.subf %0, %6 : vector<8x128xf32>
    %8 = arith.mulf %7, %7 : vector<8x128xf32>
    %cst_8 = arith.constant dense<0.000000e+00> : vector<8x128xf32>
    %9 = tpu.matmul %8, %3, %cst_8 {dimension_numbers = #tpu.dot_dimension_numbers<[1], [0], [0], [1], [0, 0, 1, 1], [], []>, precision = #tpu.contract_precision<fp32>} : vector<8x128xf32>, vector<128x128xf32>, vector<8x128xf32> -> vector<8x128xf32>
    %cst_9 = arith.constant 0.0322580636 : f32
    %10 = vector.broadcast %cst_9 : f32 to vector<8x128xf32>
    %11 = arith.mulf %9, %10 : vector<8x128xf32>
    %12 = math.sqrt %11 : vector<8x128xf32>
    %cst_10 = arith.constant 9.99999997E-7 : f32
    %13 = vector.broadcast %cst_10 : f32 to vector<8x128xf32>
    %14 = arith.addf %12, %13 : vector<8x128xf32>
    %cst_11 = arith.constant 1.000000e+00 : f32
    %15 = vector.broadcast %cst_11 : f32 to vector<8x128xf32>
    %16 = arith.divf %15, %14 : vector<8x128xf32>
    %17 = arith.mulf %7, %16 : vector<8x128xf32>
    %18 = vector.broadcast %1 : vector<1x128xf32> to vector<8x128xf32>
    %19 = arith.mulf %18, %17 : vector<8x128xf32>
    %20 = vector.broadcast %2 : vector<1x128xf32> to vector<8x128xf32>
    %21 = arith.addf %19, %20 : vector<8x128xf32>
    %c0_12 = arith.constant 0 : index
    %c0_13 = arith.constant 0 : index
    %22 = vector.load %arg5[%c0_12, %c0_13] : memref<8x128xf32, #tpu.memory_space<vmem>>, vector<8x128xf32>
    tpu.vector_store %arg5[%c0_12, %c0_13], %21 {strides = array<i32>} : memref<8x128xf32, #tpu.memory_space<vmem>>, vector<8x128xf32>,
    return
  }
  func.func @transform_0(%arg0: i32) -> (i32, i32) {
    %c0_i32 = arith.constant 0 : i32
    %c0_i32_0 = arith.constant 0 : i32
    return %arg0, %c0_i32 : i32, i32
  }
  func.func @transform_1(%arg0: i32) -> (i32, i32) {
    %c0_i32 = arith.constant 0 : i32
    %c0_i32_0 = arith.constant 0 : i32
    %c0_i32_1 = arith.constant 0 : i32
    return %c0_i32, %c0_i32_0 : i32, i32
  }
  func.func @transform_2(%arg0: i32) -> (i32, i32) {
    %c0_i32 = arith.constant 0 : i32
    %c0_i32_0 = arith.constant 0 : i32
    %c0_i32_1 = arith.constant 0 : i32
    return %c0_i32, %c0_i32_0 : i32, i32
  }
  func.func @transform_3(%arg0: i32) -> (i32, i32) {
    %c0_i32 = arith.constant 0 : i32
    %c0_i32_0 = arith.constant 0 : i32
    %c0_i32_1 = arith.constant 0 : i32
    return %c0_i32, %c0_i32_0 : i32, i32
  }
  func.func @transform_4(%arg0: i32) -> (i32, i32) {
    %c0_i32 = arith.constant 0 : i32
    %c0_i32_0 = arith.constant 0 : i32
    return %arg0, %c0_i32 : i32, i32
  }
}

</mosaic_0001>

<bundles_post_ra>
// kernel: tile.13
= control target key start
LH: loop header
LB: loop body
LE: loop exit
PB: predicated region body
PF: predicated region fallthrough
CT: control target
= control target key end

     0   :  { %s22_s0 = inlined_call_operand.vmem [shape: f32[32], index: 0, kind: input, shape index: {}]   ;;  %s23_s1 = inlined_call_operand.vmem [shape: f32[4,32], index: 1, kind: output, shape index: {}]  }
   0x1   :  { %v4_v0 = vld [vmem:[%s22_s0] ss:$0 sm:$0xff] }
   0x2   :  { %5 = vst [vmem:[%s23_s1] sm:$0xf] %v4_v0 }

// kernel: tile.14
= control target key start
LH: loop header
LB: loop body
LE: loop exit
PB: predicated region body
PF: predicated region fallthrough
CT: control target
= control target key end

     0   :  { %vm7_vm0 = vcmask 261120   ;;  %s37_s8 = smov 32   ;;  %s38_s9 = smov 64   ;;  %vm13_vm1 = vcmask 1048320   ;;  %vm19_vm2 = vcmask 785920   ;;  %vm25_vm3 = vcmask 523520   ;;  %s55_s0 = inlined_call_operand.vmem [shape: f32[4,32], index: 0, kind: input, shape index: {}]   ;;  %s56_s1 = inlined_call_operand.vmem [shape: f32[1,128], index: 1, kind: output, shape index: {}]  }
   0x1   :  { %v4_v0 = vld [vmem:[%s55_s0] sm:$0xf]  ;;  %s36_s0 = smov 96  }
   0x2   :  { %5 = vst [vmem:[#allocation1] sm:$0xf] %v4_v0 }
   0x9   :  { %v10_v1 = vld [vmem:[#allocation1 + $0x3] sm:$0x1]   ;;  %v22_v2 = vld [vmem:[#allocation1 + $0x1] sm:$0x1]   ;;  %v6_v3 = vld [vmem:[#allocation1] sm:$0x1]  }
   0xa   :  { %11 = vrot.lane.b32.xlu0 %v10_v1, %s36_s0  ;;  %23 = vrot.lane.b32.xlu1 %v22_v2, %s37_s8  ;;  %v16_v4 = vld [vmem:[#allocation1 + $0x2] sm:$0x1]   ;;  %8 = vst.msk [vmem:[#allocation0] sm:$0x1] %vm7_vm0, %v6_v3  }
   0xe   :  { %17 = vrot.lane.b32.xlu0 %v16_v4, %s38_s9 }
  0x7c   :  { %v12_v5 = vpop.permute.xlu0 %11   ;;  %v24_v6 = vpop.permute.xlu1 %23  }
  0x7d   :  { %14 = vst.msk [vmem:[#allocation0] sm:$0x1] %vm13_vm1, %v12_v5  }
  0x80   :  { %v18_v7 = vpop.permute.xlu0 %17  }
  0x81   :  { %20 = vst.msk [vmem:[#allocation0] sm:$0x1] %vm19_vm2, %v18_v7  }
  0x82   :  { %26 = vst.msk [vmem:[#allocation0] sm:$0x1] %vm25_vm3, %v24_v6  }
  0x89   :  { %v30_v8 = vld [vmem:[#allocation0] sm:$0x1] }
  0x8a   :  { %32 = vst [vmem:[%s56_s1] sm:$0x1] %v30_v8 }

// kernel: layer_norm.1
= control target key start
LH: loop header
LB: loop body
LE: loop exit
PB: predicated region body
PF: predicated region fallthrough
CT: control target
= control target key end

     0   :  { %v2328_v3 = vmov 0.0|0.0   ;;  %vm2329_vm0 = vmmov 0   ;;  %v2330_v8 = vmov 0.0   ;;  %s2807_s0 = inlined_call_operand.vmem [shape: f32[4,128], index: 0, kind: input, shape index: {}]   ;;  %s2808_s1 = inlined_call_operand.vmem [shape: f32[1,128], index: 1, kind: input, shape index: {}]   ;;  %s2809_s2 = inlined_call_operand.vmem [shape: f32[1,128], index: 2, kind: input, shape index: {}]   ;;  %s2810_s3 = inlined_call_operand.vmem [shape: f32[128,128], index: 3, kind: input, shape index: {}]   ;;  %s2811_s4 = inlined_call_operand.vmem [shape: f32[4,128], index: 4, kind: output, shape index: {}]  }
   0x1   :  { %v20_v0 = vld [vmem:[%s2810_s3] sm:$0xff]  ;;  %v21_v1 = vld [vmem:[%s2810_s3 + $0x8] sm:$0xff]  ;;  %v22_v2 = vld [vmem:[%s2810_s3 + $0x10] sm:$0xff]  ;;  %2013 = vmatprep.subr.bf16.mxu0 %v2328_v3  ;;  %1625 = vmatprep.mubr.msk.f32.mxu0 %vm2329_vm0, %v2330_v8 }
   0x2   :  { %v37_v4 = vand.u32 4294901760, %v20_v0  ;;  %v40_v5 = vand.u32 4294901760, %v21_v1  ;;  %v23_v6 = vld [vmem:[%s2810_s3 + $0x18] sm:$0xff]  ;;  %v43_v7 = vand.u32 4294901760, %v22_v2  ;;  %v24_v10 = vld [vmem:[%s2810_s3 + $0x20] sm:$0xff]  ;;  %v25_v11 = vld [vmem:[%s2810_s3 + $0x28] sm:$0xff]  ;;  %2157 = vmatprep.subr.bf16.mxu1 %v2328_v3  ;;  %1835 = vmatprep.mubr.msk.f32.mxu1 %vm2329_vm0, %v2330_v8 }
   0x3   :  { %v46_v9 = vand.u32 4294901760, %v23_v6  ;;  %v49_v14 = vand.u32 4294901760, %v24_v10  ;;  %v52_v15 = vand.u32 4294901760, %v25_v11  ;;  %v26_v16 = vld [vmem:[%s2810_s3 + $0x30] sm:$0xff]  ;;  %v27_v17 = vld [vmem:[%s2810_s3 + $0x38] sm:$0xff]  ;;  %v28_v21 = vld [vmem:[%s2810_s3 + $0x40] sm:$0xff] }
   0x4   :  { %v2380_v12 = vpack.c.bf16 %v40_v5, %v37_v4  ;;  %v55_v19 = vand.u32 4294901760, %v26_v16  ;;  %v58_v20 = vand.u32 4294901760, %v27_v17  ;;  %v2403_v22 = vld [vmem:[%s2807_s0] sm:$0xff]  ;;  %v29_v23 = vld [vmem:[%s2810_s3 + $0x48] sm:$0xff]  ;;  %v30_v24 = vld [vmem:[%s2810_s3 + $0x50] sm:$0xff]  ;;  %v61_v27 = vand.u32 4294901760, %v28_v21 }
   0x5   :  { %v2383_v13 = vpack.c.bf16 %v46_v9, %v43_v7  ;;  %v2395_v18 = vpack.c.bf16 %v52_v15, %v49_v14  ;;  %v31_v25 = vld [vmem:[%s2810_s3 + $0x58] sm:$0xff]  ;;  %v32_v26 = vld [vmem:[%s2810_s3 + $0x60] sm:$0xff]  ;;  %v33_v28 = vld [vmem:[%s2810_s3 + $0x68] sm:$0xff]  ;;  %v2430_v31 = vand.u32 4294901760, %v2403_v22  ;;  %v64_v33 = vand.u32 4294901760, %v29_v23 }
   0x6   :  { %2015 = vmatpush3.bf16.msra.mxu0 %v2380_v12  ;;  %2159 = vmatpush3.bf16.msra.mxu1 %v2380_v12  ;;  %v34_v29 = vld [vmem:[%s2810_s3 + $0x70] sm:$0xff]  ;;  %v35_v30 = vld [vmem:[%s2810_s3 + $0x78] sm:$0xff]  ;;  %v2433_v32 = vpack.c.bf16 %v58_v20, %v55_v19  ;;  %v2435_v34 = vsub.f32 %v20_v0, %v37_v4  ;;  %v2437_v35 = vsub.f32 %v21_v1, %v40_v5  ;;  %v67_v36 = vand.u32 4294901760, %v30_v24 }
   0x7   :  { %2016 = vmatprep.subr.bf16.mxu0 %v2328_v3  ;;  %2160 = vmatprep.subr.bf16.mxu1 %v2328_v3  ;;  %v70_v37 = vand.u32 4294901760, %v31_v25  ;;  %v73_v38 = vand.u32 4294901760, %v32_v26  ;;  %v76_v39 = vand.u32 4294901760, %v33_v28  ;;  %v79_v40 = vand.u32 4294901760, %v34_v29 }
   0x8   :  { %v82_v41 = vand.u32 4294901760, %v35_v30  ;;  %v2444_v42 = vsub.f32 %v2403_v22, %v2430_v31  ;;  %v2446_v43 = vsub.f32 %v22_v2, %v43_v7  ;;  %v2449_v44 = vpack.c.bf16 %v64_v33, %v61_v27 }
   0x9   :  { %v130_v45 = vand.u32 4294901760, %v2435_v34  ;;  %v137_v46 = vand.u32 4294901760, %v2437_v35  ;;  %v2453_v47 = vsub.f32 %v23_v6, %v46_v9  ;;  %v2457_v48 = vsub.f32 %v24_v10, %v49_v14 }
   0xa   :  { %2018 = vmatpush3.bf16.msra.mxu0 %v2383_v13  ;;  %2162 = vmatpush3.bf16.msra.mxu1 %v2383_v13  ;;  %v2460_v49 = vpack.c.bf16 %v70_v37, %v67_v36  ;;  %v2462_v50 = vpack.c.bf16 %v76_v39, %v73_v38  ;;  %v2464_v51 = vpack.c.bf16 %v82_v41, %v79_v40  ;;  %v119_v52 = vand.u32 4294901760, %v2444_v42 }
   0xb   :  { %2019 = vmatprep.subr.bf16.mxu0 %v2328_v3  ;;  %2163 = vmatprep.subr.bf16.mxu1 %v2328_v3  ;;  %v144_v53 = vand.u32 4294901760, %v2446_v43  ;;  %v2468_v54 = vsub.f32 %v25_v11, %v52_v15  ;;  %v2470_v55 = vsub.f32 %v26_v16, %v55_v19  ;;  %v131_v56 = vsub.f32 %v2435_v34, %v130_v45 }
   0xc   :  { %v138_v57 = vsub.f32 %v2437_v35, %v137_v46  ;;  %v151_v58 = vand.u32 4294901760, %v2453_v47  ;;  %v2476_v59 = vsub.f32 %v27_v17, %v58_v20  ;;  %v158_v60 = vand.u32 4294901760, %v2457_v48 }
   0xd   :  { %v2481_v61 = vsub.f32 %v28_v21, %v61_v27  ;;  %v2483_v62 = vsub.f32 %v29_v23, %v64_v33  ;;  %v2485_v63 = vsub.f32 %v30_v24, %v67_v36  ;;  %v2488_v0 = vsub.f32 %v31_v25, %v70_v37 }
   0xe   :  { %2021 = vmatpush3.bf16.msra.mxu0 %v2395_v18  ;;  %2165 = vmatpush3.bf16.msra.mxu1 %v2395_v18  ;;  %v2490_v1 = vsub.f32 %v32_v26, %v73_v38  ;;  %v2492_v2 = vsub.f32 %v33_v28, %v76_v39  ;;  %v2494_v4 = vsub.f32 %v34_v29, %v79_v40  ;;  %v165_v7 = vand.u32 4294901760, %v2468_v54 }
   0xf   :  { %2022 = vmatprep.subr.bf16.mxu0 %v2328_v3  ;;  %2166 = vmatprep.subr.bf16.mxu1 %v2328_v3  ;;  %v120_v5 = vsub.f32 %v2444_v42, %v119_v52  ;;  %v145_v6 = vsub.f32 %v2446_v43, %v144_v53  ;;  %v2501_v9 = vsub.f32 %v35_v30, %v82_v41  ;;  %v132_v10 = vand.u32 4294901760, %v131_v56 }
  0x10   :  { %v139_v11 = vand.u32 4294901760, %v138_v57  ;;  %v152_v14 = vsub.f32 %v2453_v47, %v151_v58  ;;  %v172_v15 = vand.u32 4294901760, %v2470_v55  ;;  %v179_v16 = vand.u32 4294901760, %v2476_v59 }
  0x11   :  { %v186_v17 = vand.u32 4294901760, %v2481_v61  ;;  %v193_v19 = vand.u32 4294901760, %v2483_v62  ;;  %v200_v20 = vand.u32 4294901760, %v2485_v63  ;;  %v207_v21 = vand.u32 4294901760, %v2488_v0 }
  0x12   :  { %2024 = vmatpush3.bf16.msra.mxu0 %v2433_v32  ;;  %2168 = vmatpush3.bf16.msra.mxu1 %v2433_v32  ;;  %v214_v23 = vand.u32 4294901760, %v2490_v1  ;;  %v221_v24 = vand.u32 4294901760, %v2492_v2  ;;  %v228_v25 = vand.u32 4294901760, %v2494_v4  ;;  %v235_v26 = vand.u32 4294901760, %v2501_v9 }
  0x13   :  { %2025 = vmatprep.subr.bf16.mxu0 %v2328_v3  ;;  %2169 = vmatprep.subr.bf16.mxu1 %v2328_v3  ;;  %v2518_v27 = vpack.c.bf16 %v137_v46, %v130_v45  ;;  %v2520_v28 = vpack.c.bf16 %v151_v58, %v144_v53  ;;  %v2522_v29 = vpack.c.bf16 %v165_v7, %v158_v60  ;;  %v121_v39 = vand.u32 4294901760, %v120_v5 }
  0x14   :  { %v2525_v30 = vpack.c.bf16 %v179_v16, %v172_v15  ;;  %v2527_v33 = vpack.c.bf16 %v193_v19, %v186_v17  ;;  %v2529_v36 = vpack.c.bf16 %v207_v21, %v200_v20  ;;  %v2531_v37 = vpack.c.bf16 %v221_v24, %v214_v23 }
  0x15   :  { %v2534_v38 = vpack.c.bf16 %v235_v26, %v228_v25  ;;  %v159_v40 = vsub.f32 %v2457_v48, %v158_v60  ;;  %v2540_v41 = vpack.c.bf16 %v139_v11, %v132_v10  ;;  %v146_v45 = vand.u32 4294901760, %v145_v6 }
  0x16   :  { %2027 = vmatpush3.bf16.msra.mxu0 %v2449_v44  ;;  %2171 = vmatpush3.bf16.msra.mxu1 %v2449_v44  ;;  %v153_v46 = vand.u32 4294901760, %v152_v14  ;;  %v166_v53 = vsub.f32 %v2468_v54, %v165_v7  ;;  %v173_v56 = vsub.f32 %v2470_v55, %v172_v15  ;;  %v180_v5 = vsub.f32 %v2476_v59, %v179_v16 }
  0x17   :  { %2028 = vmatprep.subr.bf16.mxu0 %v2328_v3  ;;  %2172 = vmatprep.subr.bf16.mxu1 %v2328_v3  ;;  %v160_v58 = vand.u32 4294901760, %v159_v40  ;;  %v187_v11 = vsub.f32 %v2481_v61, %v186_v17  ;;  %v194_v14 = vsub.f32 %v2483_v62, %v193_v19  ;;  %v201_v15 = vsub.f32 %v2485_v63, %v200_v20 }
  0x18   :  { %v2548_v57 = vpack.c.bf16 %v153_v46, %v146_v45  ;;  %v167_v60 = vand.u32 4294901760, %v166_v53  ;;  %v174_v6 = vand.u32 4294901760, %v173_v56  ;;  %v181_v10 = vand.u32 4294901760, %v180_v5 }
  0x19   :  { %v195_v40 = vand.u32 4294901760, %v194_v14  ;;  %v208_v45 = vsub.f32 %v2488_v0, %v207_v21  ;;  %v215_v46 = vsub.f32 %v2490_v1, %v214_v23  ;;  %v202_v19 = vand.u32 4294901760, %v201_v15 }
  0x1a   :  { %2030 = vmatpush3.bf16.msra.mxu0 %v2460_v49  ;;  %2174 = vmatpush3.bf16.msra.mxu1 %v2460_v49  ;;  %v2555_v7 = vpack.c.bf16 %v167_v60, %v160_v58  ;;  %v2562_v16 = vpack.c.bf16 %v181_v10, %v174_v6  ;;  %v222_v20 = vsub.f32 %v2492_v2, %v221_v24 }
  0x1b   :  { %2031 = vmatprep.subr.bf16.mxu0 %v2328_v3  ;;  %2175 = vmatprep.subr.bf16.mxu1 %v2328_v3  ;;  %v209_v53 = vand.u32 4294901760, %v208_v45  ;;  %v229_v56 = vsub.f32 %v2494_v4, %v228_v25  ;;  %v216_v21 = vand.u32 4294901760, %v215_v46  ;;  %v236_v23 = vsub.f32 %v2501_v9, %v235_v26 }
  0x1c   :  { %v223_v60 = vand.u32 4294901760, %v222_v20  ;;  %v2589_v26 = vpack.c.bf16 %v2437_v35, %v2435_v34  ;;  %v2596_v10 = vpack.c.bf16 %v2453_v47, %v2446_v43  ;;  %v2604_v34 = vpack.c.bf16 %v2468_v54, %v2457_v48 }
  0x1d   :  { %v2574_v58 = vpack.c.bf16 %v209_v53, %v202_v19  ;;  %v230_v6 = vand.u32 4294901760, %v229_v56  ;;  %v237_v24 = vand.u32 4294901760, %v236_v23  ;;  %v2610_v35 = vpack.c.bf16 %v2476_v59, %v2470_v55 }
  0x1e   :  { %2033 = vmatpush3.bf16.msra.mxu0 %v2462_v50  ;;  %2177 = vmatpush3.bf16.msra.mxu1 %v2462_v50  ;;  %v2579_v5 = vpack.c.bf16 %v223_v60, %v216_v21  ;;  %v2616_v43 = vpack.c.bf16 %v2483_v62, %v2481_v61  ;;  %v2622_v47 = vpack.c.bf16 %v2488_v0, %v2485_v63 }
  0x1f   :  { %2034 = vmatprep.subr.bf16.mxu0 %v2328_v3  ;;  %2178 = vmatprep.subr.bf16.mxu1 %v2328_v3  ;;  %v2583_v25 = vpack.c.bf16 %v237_v24, %v230_v6  ;;  %v2628_v48 = vpack.c.bf16 %v2492_v2, %v2490_v1  ;;  %v2634_v54 = vpack.c.bf16 %v2501_v9, %v2494_v4  ;;  %v1388_v4 = vld [vmem:[%s2809_s2] ss:$0 sm:$0xff] }
  0x22   :  { %2036 = vmatpush3.bf16.msra.mxu0 %v2464_v51  ;;  %2180 = vmatpush3.bf16.msra.mxu1 %v2464_v51 }
  0x23   :  { %2037 = vmatprep.subr.bf16.mxu0 %v2328_v3  ;;  %2181 = vmatprep.subr.bf16.mxu1 %v2328_v3 }
  0x25   :  { %1626 = vmatmul.mubr.f32.vlgmr.msra.gmra.mrb[0].mxu0 %v121_v39  ;;  %v188_v39 = vand.u32 4294901760, %v187_v11 }
  0x26   :  { %2039 = vmatpush3.bf16.msra.mxu0 %v2540_v41  ;;  %1660 = vmatprep.mubr.msk.f32.mxu0 %vm2329_vm0, %v2330_v8 }
  0x27   :  { %2040 = vmatprep.subr.bf16.mxu0 %v2328_v3  ;;  %v2568_v17 = vpack.c.bf16 %v195_v40, %v188_v39 }
  0x2a   :  { %2042 = vmatpush3.bf16.msra.mxu0 %v2548_v57 }
  0x2b   :  { %2043 = vmatprep.subr.bf16.mxu0 %v2328_v3 }
  0x2e   :  { %2045 = vmatpush3.bf16.msra.mxu0 %v2555_v7 }
  0x2f   :  { %2046 = vmatprep.subr.bf16.mxu0 %v2328_v3 }
  0x32   :  { %2048 = vmatpush3.bf16.msra.mxu0 %v2562_v16 }
  0x33   :  { %2049 = vmatprep.subr.bf16.mxu0 %v2328_v3 }
  0x36   :  { %2051 = vmatpush3.bf16.msra.mxu0 %v2568_v17 }
  0x37   :  { %2052 = vmatprep.subr.bf16.mxu0 %v2328_v3 }
  0x3a   :  { %2054 = vmatpush3.bf16.msra.mxu0 %v2574_v58 }
  0x3b   :  { %2055 = vmatprep.subr.bf16.mxu0 %v2328_v3 }
  0x3e   :  { %2057 = vmatpush3.bf16.msra.mxu0 %v2579_v5 }
  0x3f   :  { %2058 = vmatprep.subr.bf16.mxu0 %v2328_v3 }
  0x42   :  { %2060 = vmatpush3.bf16.msra.mxu0 %v2583_v25 }
  0x43   :  { %2061 = vmatprep.subr.bf16.mxu0 %v2328_v3 }
  0x45   :  { %1661 = vmatmul.mubr.f32.vlgmr.msra.gmra.mrb[0].mxu0 %v2430_v31 }
  0x46   :  { %2063 = vmatpush3.bf16.msra.mxu0 %v2589_v26  ;;  %1695 = vmatprep.mubr.msk.f32.mxu0 %vm2329_vm0, %v2330_v8 }
  0x47   :  { %2064 = vmatprep.subr.bf16.mxu0 %v2328_v3 }
  0x4a   :  { %2066 = vmatpush3.bf16.msra.mxu0 %v2596_v10 }
  0x4b   :  { %2067 = vmatprep.subr.bf16.mxu0 %v2328_v3 }
  0x4e   :  { %2069 = vmatpush3.bf16.msra.mxu0 %v2604_v34 }
  0x4f   :  { %2070 = vmatprep.subr.bf16.mxu0 %v2328_v3 }
  0x52   :  { %2072 = vmatpush3.bf16.msra.mxu0 %v2610_v35 }
  0x53   :  { %2073 = vmatprep.subr.bf16.mxu0 %v2328_v3 }
  0x56   :  { %2075 = vmatpush3.bf16.msra.mxu0 %v2616_v43 }
  0x57   :  { %2076 = vmatprep.subr.bf16.mxu0 %v2328_v3 }
  0x5a   :  { %2078 = vmatpush3.bf16.msra.mxu0 %v2622_v47 }
  0x5b   :  { %2079 = vmatprep.subr.bf16.mxu0 %v2328_v3 }
  0x5e   :  { %2081 = vmatpush3.bf16.msra.mxu0 %v2628_v48 }
  0x5f   :  { %2082 = vmatprep.subr.bf16.mxu0 %v2328_v3 }
  0x62   :  { %2084 = vmatpush3.bf16.msra.mxu0 %v2634_v54 }
  0x63   :  { %2085 = vmatprep.subr.bf16.mxu0 %v2328_v3 }
  0x65   :  { %1696 = vmatmul.mubr.f32.vlgmr.msra.gmra.mrb[0].mxu0 %v2444_v42 }
  0x66   :  { %2087 = vmatpush3.bf16.msra.mxu0 %v2380_v12  ;;  %1730 = vmatprep.mubr.msk.f32.mxu0 %vm2329_vm0, %v2330_v8 }
  0x67   :  { %2088 = vmatprep.subr.bf16.mxu0 %v2328_v3 }
  0x6a   :  { %2090 = vmatpush3.bf16.msra.mxu0 %v2383_v13 }
  0x6b   :  { %2091 = vmatprep.subr.bf16.mxu0 %v2328_v3 }
  0x6e   :  { %2093 = vmatpush3.bf16.msra.mxu0 %v2395_v18 }
  0x6f   :  { %2094 = vmatprep.subr.bf16.mxu0 %v2328_v3 }
  0x72   :  { %2096 = vmatpush3.bf16.msra.mxu0 %v2433_v32 }
  0x73   :  { %2097 = vmatprep.subr.bf16.mxu0 %v2328_v3 }
  0x76   :  { %2099 = vmatpush3.bf16.msra.mxu0 %v2449_v44 }
  0x77   :  { %2100 = vmatprep.subr.bf16.mxu0 %v2328_v3 }
  0x7a   :  { %2102 = vmatpush3.bf16.msra.mxu0 %v2460_v49 }
  0x7b   :  { %2103 = vmatprep.subr.bf16.mxu0 %v2328_v3 }
  0x7e   :  { %2105 = vmatpush3.bf16.msra.mxu0 %v2462_v50 }
  0x7f   :  { %2106 = vmatprep.subr.bf16.mxu0 %v2328_v3 }
  0x82   :  { %2108 = vmatpush3.bf16.msra.mxu0 %v2464_v51 }
  0x83   :  { %2109 = vmatprep.subr.bf16.mxu0 %v2328_v3 }
  0x85   :  { %1731 = vmatmul.mubr.f32.vlgmr.msra.gmra.mrb[0].mxu0 %v119_v52 }
  0x86   :  { %2111 = vmatpush3.bf16.msra.mxu0 %v2518_v27  ;;  %1765 = vmatprep.mubr.msk.f32.mxu0 %vm2329_vm0, %v2330_v8 }
  0x87   :  { %2112 = vmatprep.subr.bf16.mxu0 %v2328_v3 }
  0x8a   :  { %2114 = vmatpush3.bf16.msra.mxu0 %v2520_v28 }
  0x8b   :  { %2115 = vmatprep.subr.bf16.mxu0 %v2328_v3 }
  0x8e   :  { %2117 = vmatpush3.bf16.msra.mxu0 %v2522_v29 }
  0x8f   :  { %2118 = vmatprep.subr.bf16.mxu0 %v2328_v3 }
  0x92   :  { %2120 = vmatpush3.bf16.msra.mxu0 %v2525_v30 }
  0x93   :  { %2121 = vmatprep.subr.bf16.mxu0 %v2328_v3 }
  0x96   :  { %2123 = vmatpush3.bf16.msra.mxu0 %v2527_v33 }
  0x97   :  { %2124 = vmatprep.subr.bf16.mxu0 %v2328_v3 }
  0x9a   :  { %2126 = vmatpush3.bf16.msra.mxu0 %v2529_v36 }
  0x9b   :  { %2127 = vmatprep.subr.bf16.mxu0 %v2328_v3 }
  0x9e   :  { %2129 = vmatpush3.bf16.msra.mxu0 %v2531_v37 }
  0x9f   :  { %2130 = vmatprep.subr.bf16.mxu0 %v2328_v3 }
  0xa2   :  { %2132 = vmatpush3.bf16.msra.mxu0 %v2534_v38 }
  0xa3   :  { %2133 = vmatprep.subr.bf16.mxu0 %v2328_v3 }
  0xa5   :  { %1766 = vmatmul.mubr.f32.vlgmr.msra.gmra.mrb[0].mxu0 %v2430_v31 }
  0xa6   :  { %2135 = vmatpush3.bf16.msra.mxu0 %v2380_v12  ;;  %1800 = vmatprep.mubr.msk.f32.mxu0 %vm2329_vm0, %v2330_v8 }
  0xa7   :  { %2136 = vmatprep.subr.bf16.mxu0 %v2328_v3 }
  0xaa   :  { %2138 = vmatpush3.bf16.msra.mxu0 %v2383_v13 }
  0xab   :  { %2139 = vmatprep.subr.bf16.mxu0 %v2328_v3 }
  0xae   :  { %2141 = vmatpush3.bf16.msra.mxu0 %v2395_v18 }
  0xaf   :  { %2142 = vmatprep.subr.bf16.mxu0 %v2328_v3 }
  0xb2   :  { %2144 = vmatpush3.bf16.msra.mxu0 %v2433_v32 }
  0xb3   :  { %2145 = vmatprep.subr.bf16.mxu0 %v2328_v3 }
  0xb6   :  { %2147 = vmatpush3.bf16.msra.mxu0 %v2449_v44 }
  0xb7   :  { %2148 = vmatprep.subr.bf16.mxu0 %v2328_v3 }
  0xba   :  { %2150 = vmatpush3.bf16.msra.mxu0 %v2460_v49 }
  0xbb   :  { %2151 = vmatprep.subr.bf16.mxu0 %v2328_v3 }
  0xbe   :  { %2153 = vmatpush3.bf16.msra.mxu0 %v2462_v50 }
  0xbf   :  { %2154 = vmatprep.subr.bf16.mxu0 %v2328_v3 }
  0xc2   :  { %2156 = vmatpush3.bf16.msra.mxu0 %v2464_v51 }
  0xc5   :  { %1801 = vmatmul.mubr.f32.vlgmr.msra.gmra.mrb[0].mxu0 %v2430_v31 }
 0x198   :  { %v673_v42 = vpop.f32.mrb[0].mxu0 }
 0x199   :  { %v677_v52 = vmul.f32 0.03125, %v673_v42  ;;  %v1802_v55 = vpop.f32.mrb[1].mxu0 }
 0x19b   :  { %v2698_v59 = vsub.f32 %v2403_v22, %v677_v52 }
 0x19d   :  { %v679_v61 = vmul.f32 %v2698_v59, %v2698_v59 }
 0x19f   :  { %v2702_v62 = vand.u32 4294901760, %v679_v61 }
 0x1a1   :  { %v762_v63 = vsub.f32 %v679_v61, %v2702_v62 }
 0x1a3   :  { %v763_v0 = vand.u32 4294901760, %v762_v63 }
 0x1a5   :  { %v764_v1 = vsub.f32 %v762_v63, %v763_v0 }
 0x1a7   :  { %v765_v2 = vand.u32 4294901760, %v764_v1 }
 0x1a9   :  { %1836 = vmatmul.mubr.f32.vlgmr.msra.gmra.mrb[0].mxu1 %v765_v2 }
 0x1aa   :  { %2183 = vmatpush3.bf16.msra.mxu1 %v2540_v41  ;;  %1870 = vmatprep.mubr.msk.f32.mxu1 %vm2329_vm0, %v2330_v8 }
 0x1ab   :  { %2184 = vmatprep.subr.bf16.mxu1 %v2328_v3 }
 0x1ae   :  { %2186 = vmatpush3.bf16.msra.mxu1 %v2548_v57 }
 0x1af   :  { %2187 = vmatprep.subr.bf16.mxu1 %v2328_v3 }
 0x1b2   :  { %2189 = vmatpush3.bf16.msra.mxu1 %v2555_v7 }
 0x1b3   :  { %2190 = vmatprep.subr.bf16.mxu1 %v2328_v3 }
 0x1b6   :  { %2192 = vmatpush3.bf16.msra.mxu1 %v2562_v16 }
 0x1b7   :  { %2193 = vmatprep.subr.bf16.mxu1 %v2328_v3 }
 0x1ba   :  { %2195 = vmatpush3.bf16.msra.mxu1 %v2568_v17 }
 0x1bb   :  { %2196 = vmatprep.subr.bf16.mxu1 %v2328_v3 }
 0x1be   :  { %2198 = vmatpush3.bf16.msra.mxu1 %v2574_v58 }
 0x1bf   :  { %2199 = vmatprep.subr.bf16.mxu1 %v2328_v3 }
 0x1c2   :  { %2201 = vmatpush3.bf16.msra.mxu1 %v2579_v5 }
 0x1c3   :  { %2202 = vmatprep.subr.bf16.mxu1 %v2328_v3 }
 0x1c6   :  { %2204 = vmatpush3.bf16.msra.mxu1 %v2583_v25 }
 0x1c7   :  { %2205 = vmatprep.subr.bf16.mxu1 %v2328_v3 }
 0x1c9   :  { %1871 = vmatmul.mubr.f32.vlgmr.msra.gmra.mrb[0].mxu1 %v2702_v62 }
 0x1ca   :  { %2207 = vmatpush3.bf16.msra.mxu1 %v2589_v26  ;;  %1905 = vmatprep.mubr.msk.f32.mxu1 %vm2329_vm0, %v2330_v8 }
 0x1cb   :  { %2208 = vmatprep.subr.bf16.mxu1 %v2328_v3 }
 0x1ce   :  { %2210 = vmatpush3.bf16.msra.mxu1 %v2596_v10 }
 0x1cf   :  { %2211 = vmatprep.subr.bf16.mxu1 %v2328_v3 }
 0x1d2   :  { %2213 = vmatpush3.bf16.msra.mxu1 %v2604_v34 }
 0x1d3   :  { %2214 = vmatprep.subr.bf16.mxu1 %v2328_v3 }
 0x1d6   :  { %2216 = vmatpush3.bf16.msra.mxu1 %v2610_v35 }
 0x1d7   :  { %2217 = vmatprep.subr.bf16.mxu1 %v2328_v3 }
 0x1da   :  { %2219 = vmatpush3.bf16.msra.mxu1 %v2616_v43 }
 0x1db   :  { %2220 = vmatprep.subr.bf16.mxu1 %v2328_v3 }
 0x1de   :  { %2222 = vmatpush3.bf16.msra.mxu1 %v2622_v47 }
 0x1df   :  { %2223 = vmatprep.subr.bf16.mxu1 %v2328_v3 }
 0x1e2   :  { %2225 = vmatpush3.bf16.msra.mxu1 %v2628_v48 }
 0x1e3   :  { %2226 = vmatprep.subr.bf16.mxu1 %v2328_v3 }
 0x1e6   :  { %2228 = vmatpush3.bf16.msra.mxu1 %v2634_v54 }
 0x1e7   :  { %2229 = vmatprep.subr.bf16.mxu1 %v2328_v3 }
 0x1e9   :  { %1906 = vmatmul.mubr.f32.vlgmr.msra.gmra.mrb[0].mxu1 %v762_v63 }
 0x1ea   :  { %2231 = vmatpush3.bf16.msra.mxu1 %v2380_v12  ;;  %1940 = vmatprep.mubr.msk.f32.mxu1 %vm2329_vm0, %v2330_v8 }
 0x1eb   :  { %2232 = vmatprep.subr.bf16.mxu1 %v2328_v3 }
 0x1ee   :  { %2234 = vmatpush3.bf16.msra.mxu1 %v2383_v13 }
 0x1ef   :  { %2235 = vmatprep.subr.bf16.mxu1 %v2328_v3 }
 0x1f2   :  { %2237 = vmatpush3.bf16.msra.mxu1 %v2395_v18 }
 0x1f3   :  { %2238 = vmatprep.subr.bf16.mxu1 %v2328_v3 }
 0x1f6   :  { %2240 = vmatpush3.bf16.msra.mxu1 %v2433_v32 }
 0x1f7   :  { %2241 = vmatprep.subr.bf16.mxu1 %v2328_v3 }
 0x1fa   :  { %2243 = vmatpush3.bf16.msra.mxu1 %v2449_v44 }
 0x1fb   :  { %2244 = vmatprep.subr.bf16.mxu1 %v2328_v3 }
 0x1fe   :  { %2246 = vmatpush3.bf16.msra.mxu1 %v2460_v49 }
 0x1ff   :  { %2247 = vmatprep.subr.bf16.mxu1 %v2328_v3 }
 0x202   :  { %2249 = vmatpush3.bf16.msra.mxu1 %v2462_v50 }
 0x203   :  { %2250 = vmatprep.subr.bf16.mxu1 %v2328_v3 }
 0x206   :  { %2252 = vmatpush3.bf16.msra.mxu1 %v2464_v51 }
 0x207   :  { %2253 = vmatprep.subr.bf16.mxu1 %v2328_v3 }
 0x209   :  { %1941 = vmatmul.mubr.f32.vlgmr.msra.gmra.mrb[0].mxu1 %v763_v0 }
 0x20a   :  { %2255 = vmatpush3.bf16.msra.mxu1 %v2518_v27  ;;  %1975 = vmatprep.mubr.msk.f32.mxu1 %vm2329_vm0, %v2330_v8 }
 0x20b   :  { %2256 = vmatprep.subr.bf16.mxu1 %v2328_v3 }
 0x20e   :  { %2258 = vmatpush3.bf16.msra.mxu1 %v2520_v28 }
 0x20f   :  { %2259 = vmatprep.subr.bf16.mxu1 %v2328_v3 }
 0x212   :  { %2261 = vmatpush3.bf16.msra.mxu1 %v2522_v29 }
 0x213   :  { %2262 = vmatprep.subr.bf16.mxu1 %v2328_v3 }
 0x216   :  { %2264 = vmatpush3.bf16.msra.mxu1 %v2525_v30 }
 0x217   :  { %2265 = vmatprep.subr.bf16.mxu1 %v2328_v3 }
 0x21a   :  { %2267 = vmatpush3.bf16.msra.mxu1 %v2527_v33 }
 0x21b   :  { %2268 = vmatprep.subr.bf16.mxu1 %v2328_v3 }
 0x21e   :  { %2270 = vmatpush3.bf16.msra.mxu1 %v2529_v36 }
 0x21f   :  { %2271 = vmatprep.subr.bf16.mxu1 %v2328_v3 }
 0x222   :  { %2273 = vmatpush3.bf16.msra.mxu1 %v2531_v37 }
 0x223   :  { %2274 = vmatprep.subr.bf16.mxu1 %v2328_v3 }
 0x226   :  { %2276 = vmatpush3.bf16.msra.mxu1 %v2534_v38 }
 0x227   :  { %2277 = vmatprep.subr.bf16.mxu1 %v2328_v3 }
 0x229   :  { %1976 = vmatmul.mubr.f32.vlgmr.msra.gmra.mrb[0].mxu1 %v2702_v62 }
 0x22a   :  { %2279 = vmatpush3.bf16.msra.mxu1 %v2380_v12  ;;  %2010 = vmatprep.mubr.msk.f32.mxu1 %vm2329_vm0, %v2330_v8 }
 0x22b   :  { %2280 = vmatprep.subr.bf16.mxu1 %v2328_v3 }
 0x22e   :  { %2282 = vmatpush3.bf16.msra.mxu1 %v2383_v13 }
 0x22f   :  { %2283 = vmatprep.subr.bf16.mxu1 %v2328_v3 }
 0x232   :  { %2285 = vmatpush3.bf16.msra.mxu1 %v2395_v18 }
 0x233   :  { %2286 = vmatprep.subr.bf16.mxu1 %v2328_v3 }
 0x236   :  { %2288 = vmatpush3.bf16.msra.mxu1 %v2433_v32 }
 0x237   :  { %2289 = vmatprep.subr.bf16.mxu1 %v2328_v3 }
 0x23a   :  { %2291 = vmatpush3.bf16.msra.mxu1 %v2449_v44 }
 0x23b   :  { %2292 = vmatprep.subr.bf16.mxu1 %v2328_v3 }
 0x23e   :  { %2294 = vmatpush3.bf16.msra.mxu1 %v2460_v49 }
 0x23f   :  { %2295 = vmatprep.subr.bf16.mxu1 %v2328_v3 }
 0x242   :  { %2297 = vmatpush3.bf16.msra.mxu1 %v2462_v50 }
 0x243   :  { %2298 = vmatprep.subr.bf16.mxu1 %v2328_v3  ;;  %v1387_v3 = vld [vmem:[%s2808_s1] ss:$0 sm:$0xff] }
 0x246   :  { %2300 = vmatpush3.bf16.msra.mxu1 %v2464_v51 }
 0x249   :  { %2011 = vmatmul.mubr.f32.vlgmr.msra.gmra.mrb[0].mxu1 %v2702_v62 }
 0x31c   :  { %v1317_v8 = vpop.f32.mrb[0].mxu1 }
 0x31d   :  { %v1321_v12 = vmul.f32 0.032258064, %v1317_v8  ;;  %v2012_v13 = vpop.f32.mrb[1].mxu1 }
 0x31f   :  { %2324 = vrsqrt.f32 %v1321_v12  ;;  %vm1324_vm1 = vcmp.eq.f32.partialorder %v1321_v12, inf  ;;  %v1327_v31 = vand.u32 2147483648, %v1321_v12  ;;  %vm1326_vm2 = vcmp.eq.f32.partialorder %v1321_v12, 0.0 }
 0x329   :  { %v2325_v18 = vpop.eup %2324 }
 0x32a   :  { %v1323_v22 = vmul.f32 %v2325_v18, %v1321_v12 }
 0x32c   :  { %v1325_v32 = vsel %vm1324_vm1, %v1321_v12, %v1323_v22 }
 0x32d   :  { %v1328_v44 = vsel %vm1326_vm2, %v1327_v31, %v1325_v32 }
 0x32e   :  { %v1329_v49 = vadd.f32 1e-06, %v1328_v44 }
 0x330   :  { %2326 = vrcp.f32 %v1329_v49 }
 0x33a   :  { %v2327_v50 = vpop.eup %2326 }
 0x33b   :  { %v1332_v51 = vmul.f32 %v2327_v50, %v2698_v59 }
 0x33d   :  { %v1339_v9 = vmul.f32 %v1387_v3, %v1332_v51 }
 0x33f   :  { %v1346_v27 = vadd.f32 %v1388_v4, %v1339_v9 }
 0x341   :  { %1347 = vst [vmem:[#allocation2] sm:$0xff] %v1346_v27 }
 0x348   :  { %v1365_v28 = vld [vmem:[#allocation2] sm:$0xf] }
 0x349   :  { %1366 = vst [vmem:[%s2811_s4] sm:$0xf] %v1365_v28 }

</bundles_post_ra>
